<compile_context>
chip_gen: v7x
topology: tpu7x:2x2x1
jax: 0.10.0
libtpu: 0.0.40
codegen_flags: <defaults>
</compile_context>

<pallas_src>
import math
from functools import partial

import jax
import jax.numpy as jnp
from jax import lax
from jax.experimental import pallas as pl
from jax.experimental.pallas import tpu as pltpu


def _pack_factor(C, S):
    """Smallest p with (p*S) % 128 == 0 and C % p == 0; falls back to 1."""
    if S % 128 == 0:
        return 1
    p = 128 // math.gcd(S, 128)
    return p if (C % p == 0) else 1


def _make_mmtm_kernel(Cv, Cs, Sv, Ss, p_v, p_s):
    Cgv, Cgs = Cv // p_v, Cs // p_s

    def squeeze_contrib(x, w_ref, p, S):
        # x: (bt, C//p, p*S) packed f32 activations; w_ref: (p, C//p, dim_out)
        # TODO(synk): if compute ever binds (post-bf16, v7x), move this GAP to
        # the idle MXU as a segmented-sum matmul against a block-diagonal
        # (p*S, p) matrix of 1/S instead of the mid-lane slice + mean.
        acc = None
        for j in range(p):
            sq = jnp.mean(x[:, :, j * S:(j + 1) * S], axis=-1)          # (bt, C//p)
            term = jnp.dot(sq, w_ref[j], preferred_element_type=jnp.float32)
            acc = term if acc is None else acc + term
        return acc

    def gate_slab(g, p, S, Cg, bt):
        # g: (bt, p*Cg) gates in packed/group order -> (bt, Cg, p*S) slab
        slab = jnp.broadcast_to(g[:, :Cg][:, :, None], (bt, Cg, p * S))
        if p > 1:
            lane = lax.broadcasted_iota(jnp.int32, (bt, Cg, p * S), 2)
            for j in range(1, p):
                gj = g[:, j * Cg:(j + 1) * Cg]
                slab = jnp.where(lane >= j * S,
                                 jnp.broadcast_to(gj[:, :, None], (bt, Cg, p * S)),
                                 slab)
        return slab

    def kernel(v_ref, s_ref, wsqv_ref, wsqs_ref, bsq_ref, wg_ref, bg_ref,
               ov_ref, os_ref):
        # upcast once after load (v5e has no bf16 VPU; f32 compute everywhere)
        v = v_ref[...].astype(jnp.float32)      # (bt, Cv/p_v, p_v*Sv)
        s = s_ref[...].astype(jnp.float32)      # (bt, Cs/p_s, p_s*Ss)
        bt = v.shape[0]

        # squeeze (GAP) + fc_squeeze, concat-free: per-modality split weights
        exc = (bsq_ref[...]
               + squeeze_contrib(v, wsqv_ref, p_v, Sv)
               + squeeze_contrib(s, wsqs_ref, p_s, Ss))
        exc = jnp.maximum(exc, 0.0)

        # one fused lane-dense gate matmul (N = Cv + Cs)
        gates = jax.nn.sigmoid(
            jnp.dot(exc, wg_ref[...], preferred_element_type=jnp.float32)
            + bg_ref[...])                      # (bt, Cv + Cs)

        # channel-wise re-weighting (== view(B,C,1,1) * x), stored in io dtype
        ov_ref[...] = (v * gate_slab(gates[:, :Cv], p_v, Sv, Cgv, bt)
                       ).astype(ov_ref.dtype)
        os_ref[...] = (s * gate_slab(gates[:, Cv:Cv + Cs], p_s, Ss, Cgs, bt)
                       ).astype(os_ref.dtype)

    return kernel


def init_mmtm_params(key, dim_visual, dim_skeleton, ratio):
    """nn.Linear-style init. Weights stored as (fan_in, fan_out)."""
    dim = dim_visual + dim_skeleton
    dim_out = int(2 * dim / ratio)
    ks = jax.random.split(key, 6)

    def linear(kw, kb, fan_in, fan_out):
        bound = 1.0 / (fan_in ** 0.5)
        w = jax.random.uniform(kw, (fan_in, fan_out), jnp.float32, -bound, bound)
        b = jax.random.uniform(kb, (1, fan_out), jnp.float32, -bound, bound)
        return w, b

    wsq, bsq = linear(ks[0], ks[1], dim, dim_out)          # fc_squeeze
    wv, bv = linear(ks[2], ks[3], dim_out, dim_visual)     # fc_visual
    ws, bs = linear(ks[4], ks[5], dim_out, dim_skeleton)   # fc_skeleton
    return dict(wsq=wsq, bsq=bsq, wv=wv, bv=bv, ws=ws, bs=bs)


def pack_mmtm_params(params, Cv, Cs, Sv, Ss):
    """One-time weight repack (hoisted out of the per-call path).

    Produces weights matching the lane-dense packed activation layout used by
    mmtm_forward for these channel/spatial sizes.
    """
    p_v, p_s = _pack_factor(Cv, Sv), _pack_factor(Cs, Ss)
    wsq, bsq = params["wsq"], params["bsq"]
    wv, bv = params["wv"], params["bv"]
    ws, bs = params["ws"], params["bs"]
    dim_out = wsq.shape[1]

    # channel permutation into packed/group order (identity when p == 1)
    perm_v = jnp.arange(Cv).reshape(Cv // p_v, p_v).T.reshape(-1)
    perm_s = jnp.arange(Cs).reshape(Cs // p_s, p_s).T.reshape(-1)

    # fc_squeeze rows split per modality, grouped by pack slot
    wsq_v = wsq[:Cv][perm_v].reshape(p_v, Cv // p_v, dim_out)
    wsq_s = wsq[Cv:][perm_s].reshape(p_s, Cs // p_s, dim_out)

    # fc_visual + fc_skeleton fused into one (dim_out, Cv+Cs) matmul,
    # columns reordered to match the packed activation layout
    w_gates = jnp.concatenate([wv[:, perm_v], ws[:, perm_s]], axis=1)
    b_gates = jnp.concatenate([bv[:, perm_v], bs[:, perm_s]], axis=1)

    return dict(wsq_v=wsq_v, wsq_s=wsq_s, bsq=bsq,
                w_gates=w_gates, b_gates=b_gates)


@partial(jax.jit, static_argnames=("io_dtype",))
def mmtm_forward(visual, skeleton, packed, *, io_dtype=jnp.bfloat16):
    """visual: (B, Cv, Hv, Wv), skeleton: (B, Cs, Hs, Ws) — NCHW like PyTorch.

    Outputs are returned in io_dtype (bf16 by default halves HBM traffic; a
    fused downstream consumer should take bf16 directly — cast wrapper-side
    only if f32 is strictly required).
    """
    B, Cv, Hv, Wv = visual.shape
    _, Cs, Hs, Ws = skeleton.shape
    Sv, Ss = Hv * Wv, Hs * Ws
    p_v, p_s = _pack_factor(Cv, Sv), _pack_factor(Cs, Ss)

    wsq_v, wsq_s = packed["wsq_v"], packed["wsq_s"]
    bsq, w_gates, b_gates = packed["bsq"], packed["w_gates"], packed["b_gates"]
    assert wsq_v.shape[0] == p_v and wsq_s.shape[0] == p_s, \
        "packed params do not match these activation shapes"
    dim = Cv + Cs
    dim_out = w_gates.shape[0]

    io_dtype = jnp.dtype(io_dtype)
    itemsize = io_dtype.itemsize

    # lane-dense activation layout: pair p adjacent channels per row; cast to
    # the (bf16) I/O dtype so the kernel's HBM stream is halved.
    v_p = visual.astype(io_dtype).reshape(B, Cv // p_v, p_v * Sv)
    s_p = skeleton.astype(io_dtype).reshape(B, Cs // p_s, p_s * Ss)

    # ---- tiling: biggest batch tile that fits the per-generation VMEM budget
    try:
        info = pltpu.get_tpu_info()
        vmem_cap = int(getattr(info, "vmem_capacity_bytes", 64 << 20))
    except Exception:  # pragma: no cover - conservative fallback
        vmem_cap = 64 << 20                      # v7x-sized (smallest) VMEM
    vmem_budget = (vmem_cap * 3) // 4            # ~48 MiB v7x, ~96 MiB v5e/v6e

    weight_bytes = sum(int(a.size) * a.dtype.itemsize
                       for a in (wsq_v, wsq_s, bsq, w_gates, b_gates))
    per_b_io = 2 * itemsize * (Cv * Sv + Cs * Ss)        # in + out per batch elem
    # ~16 MiB of activation blocks per step (per-step 0.35us overhead becomes
    # negligible vs. drain time), double-buffered blocks + weights <= budget.
    bt = max(1, min((16 << 20) // per_b_io,
                    (vmem_budget - weight_bytes) // (2 * per_b_io),
                    B))
    # TODO(synk): if a single batch element's in+out blocks ever exceed the
    # v7x budget, add a channel-axis grid dimension (GAP is per-channel, so no
    # two-phase reduction needed); spatial is never tiled.

    # only v7x has 2 TensorCores; keep >= 2 "parallel" grid steps there so the
    # batch shards across both cores. Single-TC v5e/v6e take one big tile.
    try:
        is_v7x = "v7" in jax.devices()[0].device_kind.lower()
    except Exception:  # pragma: no cover
        is_v7x = False
    if is_v7x and B >= 2:
        bt = min(bt, -(-B // 2))

    # pad B to a multiple of bt instead of shrinking bt to a divisor of B
    # (avoids collapsing to many tiny grid steps for odd / prime B).
    Bp = -(-B // bt) * bt
    if Bp != B:
        v_p = jnp.pad(v_p, ((0, Bp - B), (0, 0), (0, 0)))
        s_p = jnp.pad(s_p, ((0, Bp - B), (0, 0), (0, 0)))
    grid = (Bp // bt,)

    vmem_limit = int(min(vmem_budget,
                         max(32 << 20, 2 * bt * per_b_io + weight_bytes + (4 << 20))))

    kernel = _make_mmtm_kernel(Cv, Cs, Sv, Ss, p_v, p_s)

    act_v_spec = pl.BlockSpec((bt, Cv // p_v, p_v * Sv), lambda i: (i, 0, 0))
    act_s_spec = pl.BlockSpec((bt, Cs // p_s, p_s * Ss), lambda i: (i, 0, 0))
    w3 = lambda a: pl.BlockSpec(a.shape, lambda i: (0, 0, 0))   # resident weights
    w2 = lambda a: pl.BlockSpec(a.shape, lambda i: (0, 0))

    cost = pl.CostEstimate(
        flops=2 * B * dim_out * (dim + dim) + 4 * B * (Cv * Sv + Cs * Ss),
        transcendentals=B * dim,
        bytes_accessed=int(per_b_io * B
                           + 4 * (2 * dim * dim_out + dim_out + dim)),
    )

    # NOTE: no input_output_aliases here — the activations are reshaped views
    # of non-donated jit args, so aliasing would force a defensive copy.
    out_v, out_s = pl.pallas_call(
        kernel,
        out_shape=(jax.ShapeDtypeStruct(v_p.shape, io_dtype),
                   jax.ShapeDtypeStruct(s_p.shape, io_dtype)),
        grid_spec=pltpu.PrefetchScalarGridSpec(
            num_scalar_prefetch=0,
            grid=grid,
            in_specs=[act_v_spec, act_s_spec,
                      w3(wsq_v), w3(wsq_s),
                      w2(bsq), w2(w_gates), w2(b_gates)],
            out_specs=(act_v_spec, act_s_spec),
        ),
        compiler_params=pltpu.CompilerParams(
            dimension_semantics=("parallel",),
            vmem_limit_bytes=vmem_limit),
        cost_estimate=cost,
    )(v_p, s_p, wsq_v, wsq_s, bsq, w_gates, b_gates)

    if Bp != B:
        out_v, out_s = out_v[:B], out_s[:B]
    return out_v.reshape(B, Cv, Hv, Wv), out_s.reshape(B, Cs, Hs, Ws)


def mmtm_reference(visual, skeleton, params):
    """Pure-JAX reference mirroring the PyTorch MMTM.forward."""
    wsq, bsq = params["wsq"], params["bsq"]
    wv, bv = params["wv"], params["bv"]
    ws, bs = params["ws"], params["bs"]
    B = visual.shape[0]
    sq_v = visual.reshape(B, visual.shape[1], -1).mean(-1)
    sq_s = skeleton.reshape(B, skeleton.shape[1], -1).mean(-1)
    squeeze = jnp.concatenate([sq_v, sq_s], axis=1)
    exc = jnp.maximum(squeeze @ wsq + bsq, 0.0)
    gv = jax.nn.sigmoid(exc @ wv + bv)
    gs = jax.nn.sigmoid(exc @ ws + bs)
    return visual * gv[:, :, None, None], skeleton * gs[:, :, None, None]


if __name__ == "__main__":
    key = jax.random.PRNGKey(0)
    k_v, k_s, k_p = jax.random.split(key, 3)

    # mmtm_64 = MMTM(64, 64, 4): visual feat (B,64,16,16), radar feat (B,64,8,8)
    B, Cv, Cs = 2, 64, 64
    visual = jax.random.normal(k_v, (B, Cv, 16, 16), jnp.float32)
    skeleton = jax.random.normal(k_s, (B, Cs, 8, 8), jnp.float32)
    params = init_mmtm_params(k_p, dim_visual=Cv, dim_skeleton=Cs, ratio=4)
    packed = pack_mmtm_params(params, Cv, Cs, Sv=16 * 16, Ss=8 * 8)

    ref_v, ref_s = mmtm_reference(visual, skeleton, params)

    # f32 I/O path: tight check against the PyTorch-equivalent reference.
    out_v, out_s = mmtm_forward(visual, skeleton, packed, io_dtype=jnp.float32)
    jax.block_until_ready((out_v, out_s))
    assert jnp.allclose(out_v, ref_v, atol=1e-4, rtol=1e-4)
    assert jnp.allclose(out_s, ref_s, atol=1e-4, rtol=1e-4)

    # default bf16 I/O path (half the HBM traffic): bf16-appropriate tolerance.
    out_v16, out_s16 = mmtm_forward(visual, skeleton, packed,
                                    io_dtype=jnp.bfloat16)
    jax.block_until_ready((out_v16, out_s16))
    assert jnp.allclose(out_v16.astype(jnp.float32), ref_v, atol=5e-2, rtol=5e-2)
    assert jnp.allclose(out_s16.astype(jnp.float32), ref_s, atol=5e-2, rtol=5e-2)

    print("KERNEL_OK")
</pallas_src>

<mosaic_0001>
module attributes {stable_mosaic.version = 11 : i64} {
  func.func @kernel(%arg0: i32, %arg1: memref<2x64x256xf32, #tpu.memory_space<vmem>>, %arg2: memref<2x32x128xf32, #tpu.memory_space<vmem>>, %arg3: memref<1x64x64xf32, #tpu.memory_space<vmem>>, %arg4: memref<2x32x64xf32, #tpu.memory_space<vmem>>, %arg5: memref<1x64xf32, #tpu.memory_space<vmem>>, %arg6: memref<64x128xf32, #tpu.memory_space<vmem>>, %arg7: memref<1x128xf32, #tpu.memory_space<vmem>>, %arg8: memref<2x64x256xf32, #tpu.memory_space<vmem>>, %arg9: memref<2x32x128xf32, #tpu.memory_space<vmem>>) attributes {dimension_semantics = [#tpu.dimension_semantics<parallel>], iteration_bounds = array<i64: 1>, scalar_prefetch = 0 : i64, scratch_operands = 0 : i64, tpu.core_type = #tpu.core_type<tc>, window_params = [{transform_indices = @transform_0, window_bounds = array<i64: 2, 64, 256>}, {transform_indices = @transform_1, window_bounds = array<i64: 2, 32, 128>}, {pipeline_mode = #tpu.pipeline_mode<synchronous>, transform_indices = @transform_2, window_bounds = array<i64: 1, 64, 64>}, {pipeline_mode = #tpu.pipeline_mode<synchronous>, transform_indices = @transform_3, window_bounds = array<i64: 2, 32, 64>}, {pipeline_mode = #tpu.pipeline_mode<synchronous>, transform_indices = @transform_4, window_bounds = array<i64: 1, 64>}, {pipeline_mode = #tpu.pipeline_mode<synchronous>, transform_indices = @transform_5, window_bounds = array<i64: 64, 128>}, {pipeline_mode = #tpu.pipeline_mode<synchronous>, transform_indices = @transform_6, window_bounds = array<i64: 1, 128>}, {transform_indices = @transform_7, window_bounds = array<i64: 2, 64, 256>}, {transform_indices = @transform_8, window_bounds = array<i64: 2, 32, 128>}]} {
    %c0 = arith.constant 0 : index
    %c0_0 = arith.constant 0 : index
    %c0_1 = arith.constant 0 : index
    %0 = vector.load %arg1[%c0, %c0_0, %c0_1] : memref<2x64x256xf32, #tpu.memory_space<vmem>>, vector<2x64x256xf32>
    %c0_2 = arith.constant 0 : index
    %c0_3 = arith.constant 0 : index
    %c0_4 = arith.constant 0 : index
    %1 = vector.load %arg2[%c0_2, %c0_3, %c0_4] : memref<2x32x128xf32, #tpu.memory_space<vmem>>, vector<2x32x128xf32>
    %c0_5 = arith.constant 0 : index
    %c0_6 = arith.constant 0 : index
    %2 = vector.load %arg5[%c0_5, %c0_6] : memref<1x64xf32, #tpu.memory_space<vmem>>, vector<1x64xf32>
    %cst = arith.constant dense<0.000000e+00> : vector<2x64xf32>
    %3 = vector.multi_reduction <add>, %0, %cst [2] : vector<2x64x256xf32> to vector<2x64xf32>
    %cst_7 = arith.constant 2.560000e+02 : f32
    %4 = vector.broadcast %cst_7 : f32 to vector<2x64xf32>
    %5 = arith.divf %3, %4 : vector<2x64xf32>
    %c0_8 = arith.constant 0 : index
    %c0_9 = arith.constant 0 : index
    %c0_10 = arith.constant 0 : index
    %6 = vector.load %arg3[%c0_8, %c0_9, %c0_10] : memref<1x64x64xf32, #tpu.memory_space<vmem>>, vector<1x64x64xf32>
    %7 = vector.shape_cast %6 : vector<1x64x64xf32> to vector<64x64xf32>
    %cst_11 = arith.constant dense<0.000000e+00> : vector<2x64xf32>
    %8 = tpu.matmul %5, %7, %cst_11 {dimension_numbers = #tpu.dot_dimension_numbers<[1], [0], [0], [1], [0, 0, 1, 1], [], []>} : vector<2x64xf32>, vector<64x64xf32>, vector<2x64xf32> -> vector<2x64xf32>
    %9 = vector.broadcast %2 : vector<1x64xf32> to vector<2x64xf32>
    %10 = arith.addf %9, %8 : vector<2x64xf32>
    %11 = vector.extract_strided_slice %1 {offsets = [0, 0, 0], sizes = [2, 32, 64], strides = [1, 1, 1]} : vector<2x32x128xf32> to vector<2x32x64xf32>
    %cst_12 = arith.constant dense<0.000000e+00> : vector<2x32xf32>
    %12 = vector.multi_reduction <add>, %11, %cst_12 [2] : vector<2x32x64xf32> to vector<2x32xf32>
    %cst_13 = arith.constant 6.400000e+01 : f32
    %13 = vector.broadcast %cst_13 : f32 to vector<2x32xf32>
    %14 = arith.divf %12, %13 : vector<2x32xf32>
    %c0_14 = arith.constant 0 : index
    %c0_15 = arith.constant 0 : index
    %c0_16 = arith.constant 0 : index
    %15 = vector.load %arg4[%c0_14, %c0_15, %c0_16] : memref<2x32x64xf32, #tpu.memory_space<vmem>>, vector<1x32x64xf32>
    %16 = vector.shape_cast %15 : vector<1x32x64xf32> to vector<32x64xf32>
    %cst_17 = arith.constant dense<0.000000e+00> : vector<2x64xf32>
    %17 = tpu.matmul %14, %16, %cst_17 {dimension_numbers = #tpu.dot_dimension_numbers<[1], [0], [0], [1], [0, 0, 1, 1], [], []>} : vector<2x32xf32>, vector<32x64xf32>, vector<2x64xf32> -> vector<2x64xf32>
    %18 = vector.extract_strided_slice %1 {offsets = [0, 0, 64], sizes = [2, 32, 64], strides = [1, 1, 1]} : vector<2x32x128xf32> to vector<2x32x64xf32>
    %cst_18 = arith.constant dense<0.000000e+00> : vector<2x32xf32>
    %19 = vector.multi_reduction <add>, %18, %cst_18 [2] : vector<2x32x64xf32> to vector<2x32xf32>
    %cst_19 = arith.constant 6.400000e+01 : f32
    %20 = vector.broadcast %cst_19 : f32 to vector<2x32xf32>
    %21 = arith.divf %19, %20 : vector<2x32xf32>
    %c1 = arith.constant 1 : index
    %c0_20 = arith.constant 0 : index
    %c0_21 = arith.constant 0 : index
    %22 = vector.load %arg4[%c1, %c0_20, %c0_21] : memref<2x32x64xf32, #tpu.memory_space<vmem>>, vector<1x32x64xf32>
    %23 = vector.shape_cast %22 : vector<1x32x64xf32> to vector<32x64xf32>
    %cst_22 = arith.constant dense<0.000000e+00> : vector<2x64xf32>
    %24 = tpu.matmul %21, %23, %cst_22 {dimension_numbers = #tpu.dot_dimension_numbers<[1], [0], [0], [1], [0, 0, 1, 1], [], []>} : vector<2x32xf32>, vector<32x64xf32>, vector<2x64xf32> -> vector<2x64xf32>
    %25 = arith.addf %17, %24 : vector<2x64xf32>
    %26 = arith.addf %10, %25 : vector<2x64xf32>
    %cst_23 = arith.constant 0.000000e+00 : f32
    %27 = vector.broadcast %cst_23 : f32 to vector<2x64xf32>
    %28 = arith.maximumf %26, %27 : vector<2x64xf32>
    %c0_24 = arith.constant 0 : index
    %c0_25 = arith.constant 0 : index
    %29 = vector.load %arg6[%c0_24, %c0_25] : memref<64x128xf32, #tpu.memory_space<vmem>>, vector<64x128xf32>
    %cst_26 = arith.constant dense<0.000000e+00> : vector<2x128xf32>
    %30 = tpu.matmul %28, %29, %cst_26 {dimension_numbers = #tpu.dot_dimension_numbers<[1], [0], [0], [1], [0, 0, 1, 1], [], []>} : vector<2x64xf32>, vector<64x128xf32>, vector<2x128xf32> -> vector<2x128xf32>
    %c0_27 = arith.constant 0 : index
    %c0_28 = arith.constant 0 : index
    %31 = vector.load %arg7[%c0_27, %c0_28] : memref<1x128xf32, #tpu.memory_space<vmem>>, vector<1x128xf32>
    %32 = vector.broadcast %31 : vector<1x128xf32> to vector<2x128xf32>
    %33 = arith.addf %30, %32 : vector<2x128xf32>
    %34 = arith.negf %33 : vector<2x128xf32>
    %35 = math.exp %34 : vector<2x128xf32>
    %cst_29 = arith.constant 1.000000e+00 : f32
    %36 = vector.broadcast %cst_29 : f32 to vector<2x128xf32>
    %37 = arith.addf %36, %35 : vector<2x128xf32>
    %38 = arith.divf %36, %37 : vector<2x128xf32>
    %39 = vector.extract_strided_slice %38 {offsets = [0, 0], sizes = [2, 64], strides = [1, 1]} : vector<2x128xf32> to vector<2x64xf32>
    %40 = vector.shape_cast %39 : vector<2x64xf32> to vector<2x64x1xf32>
    %41 = vector.shape_cast %40 : vector<2x64x1xf32> to vector<2x64x1xf32>
    %42 = vector.broadcast %41 : vector<2x64x1xf32> to vector<2x64x256xf32>
    %43 = arith.mulf %0, %42 : vector<2x64x256xf32>
    %c0_30 = arith.constant 0 : index
    %c0_31 = arith.constant 0 : index
    %c0_32 = arith.constant 0 : index
    %44 = vector.load %arg8[%c0_30, %c0_31, %c0_32] : memref<2x64x256xf32, #tpu.memory_space<vmem>>, vector<2x64x256xf32>
    tpu.vector_store %arg8[%c0_30, %c0_31, %c0_32], %43 {strides = array<i32>} : memref<2x64x256xf32, #tpu.memory_space<vmem>>, vector<2x64x256xf32>,
    %45 = vector.extract_strided_slice %38 {offsets = [0, 64], sizes = [2, 64], strides = [1, 1]} : vector<2x128xf32> to vector<2x64xf32>
    %46 = vector.extract_strided_slice %45 {offsets = [0, 0], sizes = [2, 32], strides = [1, 1]} : vector<2x64xf32> to vector<2x32xf32>
    %47 = vector.shape_cast %46 : vector<2x32xf32> to vector<2x32x1xf32>
    %48 = vector.shape_cast %47 : vector<2x32x1xf32> to vector<2x32x1xf32>
    %49 = vector.broadcast %48 : vector<2x32x1xf32> to vector<2x32x128xf32>
    %50 = tpu.iota {dimensions = array<i32: 2>} : vector<2x32x128xi32>
    %51 = vector.extract_strided_slice %45 {offsets = [0, 32], sizes = [2, 32], strides = [1, 1]} : vector<2x64xf32> to vector<2x32xf32>
    %c64_i32 = arith.constant 64 : i32
    %52 = vector.broadcast %c64_i32 : i32 to vector<2x32x128xi32>
    %53 = arith.cmpi sge, %50, %52 : vector<2x32x128xi32>
    %54 = vector.shape_cast %51 : vector<2x32xf32> to vector<2x32x1xf32>
    %55 = vector.shape_cast %54 : vector<2x32x1xf32> to vector<2x32x1xf32>
    %56 = vector.broadcast %55 : vector<2x32x1xf32> to vector<2x32x128xf32>
    %57 = arith.select %53, %56, %49 : vector<2x32x128xi1>, vector<2x32x128xf32>
    %58 = arith.mulf %1, %57 : vector<2x32x128xf32>
    %c0_33 = arith.constant 0 : index
    %c0_34 = arith.constant 0 : index
    %c0_35 = arith.constant 0 : index
    %59 = vector.load %arg9[%c0_33, %c0_34, %c0_35] : memref<2x32x128xf32, #tpu.memory_space<vmem>>, vector<2x32x128xf32>
    tpu.vector_store %arg9[%c0_33, %c0_34, %c0_35], %58 {strides = array<i32>} : memref<2x32x128xf32, #tpu.memory_space<vmem>>, vector<2x32x128xf32>,
    return
  }
  func.func @transform_0(%arg0: i32) -> (i32, i32, i32) {
    %c0_i32 = arith.constant 0 : i32
    %c0_i32_0 = arith.constant 0 : i32
    %c0_i32_1 = arith.constant 0 : i32
    return %arg0, %c0_i32, %c0_i32_0 : i32, i32, i32
  }
  func.func @transform_1(%arg0: i32) -> (i32, i32, i32) {
    %c0_i32 = arith.constant 0 : i32
    %c0_i32_0 = arith.constant 0 : i32
    %c0_i32_1 = arith.constant 0 : i32
    return %arg0, %c0_i32, %c0_i32_0 : i32, i32, i32
  }
  func.func @transform_2(%arg0: i32) -> (i32, i32, i32) {
    %c0_i32 = arith.constant 0 : i32
    %c0_i32_0 = arith.constant 0 : i32
    %c0_i32_1 = arith.constant 0 : i32
    %c0_i32_2 = arith.constant 0 : i32
    return %c0_i32, %c0_i32_0, %c0_i32_1 : i32, i32, i32
  }
  func.func @transform_3(%arg0: i32) -> (i32, i32, i32) {
    %c0_i32 = arith.constant 0 : i32
    %c0_i32_0 = arith.constant 0 : i32
    %c0_i32_1 = arith.constant 0 : i32
    %c0_i32_2 = arith.constant 0 : i32
    return %c0_i32, %c0_i32_0, %c0_i32_1 : i32, i32, i32
  }
  func.func @transform_4(%arg0: i32) -> (i32, i32) {
    %c0_i32 = arith.constant 0 : i32
    %c0_i32_0 = arith.constant 0 : i32
    %c0_i32_1 = arith.constant 0 : i32
    return %c0_i32, %c0_i32_0 : i32, i32
  }
  func.func @transform_5(%arg0: i32) -> (i32, i32) {
    %c0_i32 = arith.constant 0 : i32
    %c0_i32_0 = arith.constant 0 : i32
    %c0_i32_1 = arith.constant 0 : i32
    return %c0_i32, %c0_i32_0 : i32, i32
  }
  func.func @transform_6(%arg0: i32) -> (i32, i32) {
    %c0_i32 = arith.constant 0 : i32
    %c0_i32_0 = arith.constant 0 : i32
    %c0_i32_1 = arith.constant 0 : i32
    return %c0_i32, %c0_i32_0 : i32, i32
  }
  func.func @transform_7(%arg0: i32) -> (i32, i32, i32) {
    %c0_i32 = arith.constant 0 : i32
    %c0_i32_0 = arith.constant 0 : i32
    %c0_i32_1 = arith.constant 0 : i32
    return %arg0, %c0_i32, %c0_i32_0 : i32, i32, i32
  }
  func.func @transform_8(%arg0: i32) -> (i32, i32, i32) {
    %c0_i32 = arith.constant 0 : i32
    %c0_i32_0 = arith.constant 0 : i32
    %c0_i32_1 = arith.constant 0 : i32
    return %arg0, %c0_i32, %c0_i32_0 : i32, i32, i32
  }
}

</mosaic_0001>

<bundles_post_ra>
// kernel: mmtm_forward.1
= control target key start
LH: loop header
LB: loop body
LE: loop exit
PB: predicated region body
PF: predicated region fallthrough
CT: control target
= control target key end

     0   :  { %s1152_s9 = smov 64   ;;  %vm254_vm0 = vcmask 523264   ;;  %vm1154_vm1 = vmmov 0   ;;  %vm169_vm2 = vcmask 130112   ;;  %vm176_vm3 = vcmask 195712   ;;  %s1819_s1 = inlined_call_operand.vmem [shape: f32[2,32,128], index: 1, kind: input, shape index: {}]   ;;  %s1820_s0 = inlined_call_operand.vmem [shape: f32[2,64,256], index: 0, kind: input, shape index: {}]   ;;  %s1821_s2 = inlined_call_operand.vmem [shape: f32[1,64,64], index: 2, kind: input, shape index: {}]   ;;  %s1822_s3 = inlined_call_operand.vmem [shape: f32[2,32,64], index: 3, kind: input, shape index: {}]   ;;  %s1823_s5 = inlined_call_operand.vmem [shape: f32[64,128], index: 5, kind: input, shape index: {}]   ;;  %s1824_s4 = inlined_call_operand.vmem [shape: f32[1,64], index: 4, kind: input, shape index: {}]   ;;  %s1825_s6 = inlined_call_operand.vmem [shape: f32[1,128], index: 6, kind: input, shape index: {}]   ;;  %s1826_s7 = inlined_call_operand.vmem [shape: f32[2,64,256], index: 7, kind: output, shape index: {0}]   ;;  %s1827_s8 = inlined_call_operand.vmem [shape: f32[2,32,128], index: 8, kind: output, shape index: {1}]  }
   0x1   :  { %v1204_v0 = vld [vmem:[%s1819_s1] sm:$0xff]  ;;  %v1216_v2 = vld [vmem:[%s1819_s1 + $0x8] sm:$0xff]  ;;  %v1228_v4 = vld [vmem:[%s1819_s1 + $0x10] sm:$0xff]  ;;  %vm183_vm4 = vcmask 261312   ;;  %vm190_vm5 = vcmask 326912   ;;  %vm197_vm6 = vcmask 392512  }
   0x2   :  { %v1209_v1 = vld [vmem:[%s1819_s1 + $0x20] sm:$0xff]  ;;  %379 = vrot.lane.b32.xlu0 %v1204_v0, %s1152_s9  ;;  %v1221_v3 = vld [vmem:[%s1819_s1 + $0x28] sm:$0xff]  ;;  %v1233_v5 = vld [vmem:[%s1819_s1 + $0x30] sm:$0xff]  ;;  %v334_v56 = vsel %vm254_vm0, %v1204_v0, 0.0  ;;  %v337_v57 = vsel %vm254_vm0, %v1216_v2, 0.0  ;;  %v340_v63 = vsel %vm254_vm0, %v1228_v4, 0.0 }
   0x3   :  { %387 = vrot.lane.b32.xlu1 %v1209_v1, %s1152_s9  ;;  %v1240_v6 = vld [vmem:[%s1819_s1 + $0x18] sm:$0xff]  ;;  %v1252_v8 = vld [vmem:[%s1820_s0] sm:$0xff]  ;;  %v1257_v9 = vld [vmem:[%s1820_s0 + $0x8] sm:$0xff]  ;;  %v346_v58 = vsel %vm254_vm0, %v1209_v1, 0.0  ;;  %v349_v61 = vsel %vm254_vm0, %v1221_v3, 0.0  ;;  %vm204_vm7 = vcmask 458112  }
   0x4   :  { %v1245_v7 = vld [vmem:[%s1819_s1 + $0x38] sm:$0xff]  ;;  %v69_v10 = vadd.f32 %v1257_v9, %v1252_v8  ;;  %v1264_v11 = vld [vmem:[%s1820_s0 + $0x80] sm:$0xff]  ;;  %v1269_v12 = vld [vmem:[%s1820_s0 + $0x88] sm:$0xff]  ;;  %vm211_vm8 = vcmask 523712   ;;  %vm252_vm9 = vcmask 1041409   ;;  %vm487_vm10 = vcmask 261120  }
   0x5   :  { %v1274_v13 = vld [vmem:[%s1820_s0 + $0x10] sm:$0xff]  ;;  %v1279_v14 = vld [vmem:[%s1820_s0 + $0x18] sm:$0xff]  ;;  %v93_v15 = vadd.f32 %v1269_v12, %v1264_v11  ;;  %v1298_v19 = vld [vmem:[%s1820_s0 + $0x20] sm:$0xff] }
   0x6   :  { %381 = vrot.lane.b32.xlu0 %v1216_v2, %s1152_s9  ;;  %v72_v16 = vadd.f32 %v1279_v14, %v1274_v13  ;;  %v1288_v17 = vld [vmem:[%s1820_s0 + $0x90] sm:$0xff]  ;;  %v1293_v18 = vld [vmem:[%s1820_s0 + $0x98] sm:$0xff]  ;;  %v1303_v20 = vld [vmem:[%s1820_s0 + $0x28] sm:$0xff] }
   0x7   :  { %389 = vrot.lane.b32.xlu1 %v1221_v3, %s1152_s9  ;;  %1844 = vst [vmem:[#allocation2_spill] sm:$0xff] %v1288_v17  ;;  %1845 = vst [vmem:[#allocation3_spill] sm:$0xff] %v1293_v18  ;;  %v96_v21 = vadd.f32 %v1293_v18, %v1288_v17  ;;  %v75_v22 = vadd.f32 %v1303_v20, %v1298_v19  ;;  %v1312_v23 = vld [vmem:[%s1820_s0 + $0xa0] sm:$0xff]  ;;  %v1317_v24 = vld [vmem:[%s1820_s0 + $0xa8] sm:$0xff] }
   0x8   :  { %v1322_v25 = vld [vmem:[%s1820_s0 + $0x30] sm:$0xff]  ;;  %v1327_v26 = vld [vmem:[%s1820_s0 + $0x38] sm:$0xff]  ;;  %v99_v27 = vadd.f32 %v1317_v24, %v1312_v23  ;;  %v1346_v31 = vld [vmem:[%s1820_s0 + $0x40] sm:$0xff] }
   0x9   :  { %v78_v28 = vadd.f32 %v1327_v26, %v1322_v25  ;;  %v1336_v29 = vld [vmem:[%s1820_s0 + $0xb0] sm:$0xff]  ;;  %v1341_v30 = vld [vmem:[%s1820_s0 + $0xb8] sm:$0xff]  ;;  %v1351_v32 = vld [vmem:[%s1820_s0 + $0x48] sm:$0xff] }
   0xa   :  { %383 = vrot.lane.b32.xlu0 %v1228_v4, %s1152_s9  ;;  %1846 = vst [vmem:[#allocation4_spill] sm:$0xff] %v1336_v29  ;;  %1847 = vst [vmem:[#allocation5_spill] sm:$0xff] %v1341_v30  ;;  %v102_v33 = vadd.f32 %v1341_v30, %v1336_v29  ;;  %v81_v34 = vadd.f32 %v1351_v32, %v1346_v31  ;;  %v1360_v35 = vld [vmem:[%s1820_s0 + $0xc0] sm:$0xff]  ;;  %v1365_v36 = vld [vmem:[%s1820_s0 + $0xc8] sm:$0xff] }
   0xb   :  { %391 = vrot.lane.b32.xlu1 %v1233_v5, %s1152_s9  ;;  %1848 = vst [vmem:[#allocation6_spill] sm:$0xff] %v1360_v35  ;;  %1849 = vst [vmem:[#allocation7_spill] sm:$0xff] %v1365_v36  ;;  %v1370_v37 = vld [vmem:[%s1820_s0 + $0x50] sm:$0xff]  ;;  %v1375_v38 = vld [vmem:[%s1820_s0 + $0x58] sm:$0xff]  ;;  %v105_v39 = vadd.f32 %v1365_v36, %v1360_v35 }
   0xc   :  { %v84_v40 = vadd.f32 %v1375_v38, %v1370_v37  ;;  %v1384_v41 = vld [vmem:[%s1820_s0 + $0xd0] sm:$0xff]  ;;  %v1389_v42 = vld [vmem:[%s1820_s0 + $0xd8] sm:$0xff]  ;;  %v1394_v43 = vld [vmem:[%s1820_s0 + $0x60] sm:$0xff] }
   0xd   :  { %1850 = vst [vmem:[#allocation8_spill] sm:$0xff] %v1384_v41  ;;  %1851 = vst [vmem:[#allocation9_spill] sm:$0xff] %v1389_v42  ;;  %v1399_v44 = vld [vmem:[%s1820_s0 + $0x68] sm:$0xff]  ;;  %v108_v45 = vadd.f32 %v1389_v42, %v1384_v41  ;;  %v1408_v47 = vld [vmem:[%s1820_s0 + $0xe0] sm:$0xff] }
   0xe   :  { %385 = vrot.lane.b32.xlu0 %v1240_v6, %s1152_s9  ;;  %v87_v46 = vadd.f32 %v1399_v44, %v1394_v43  ;;  %1852 = vst [vmem:[#allocation10_spill] sm:$0xff] %v1408_v47  ;;  %v1413_v48 = vld [vmem:[%s1820_s0 + $0xe8] sm:$0xff]  ;;  %v1418_v49 = vld [vmem:[%s1820_s0 + $0x70] sm:$0xff]  ;;  %v1423_v50 = vld [vmem:[%s1820_s0 + $0x78] sm:$0xff] }
   0xf   :  { %393 = vrot.lane.b32.xlu1 %v1245_v7, %s1152_s9  ;;  %1853 = vst [vmem:[#allocation11_spill] sm:$0xff] %v1413_v48  ;;  %v111_v51 = vadd.f32 %v1413_v48, %v1408_v47  ;;  %v90_v52 = vadd.f32 %v1423_v50, %v1418_v49  ;;  %v1432_v53 = vld [vmem:[%s1820_s0 + $0xf0] sm:$0xff]  ;;  %v1437_v54 = vld [vmem:[%s1820_s0 + $0xf8] sm:$0xff]  ;;  %v134_v59 = vld [vmem:[%s1821_s2] sm:$0xff] }
  0x10   :  { %1854 = vst [vmem:[#allocation12_spill] sm:$0xff] %v1432_v53  ;;  %1855 = vst [vmem:[#allocation13_spill] sm:$0xff] %v1437_v54  ;;  %v114_v55 = vadd.f32 %v1437_v54, %v1432_v53  ;;  %v135_v60 = vld [vmem:[%s1821_s2 + $0x8] sm:$0xff] }
  0x11   :  { %v1106_v62 = vpack.c.bf16 %v135_v60, %v134_v59 }
  0x2d   :  { %70 = vadd.xlane.f32.xlu0 %v69_v10  ;;  %v1828_v10 = vmov 0.0|0.0  }
  0x2e   :  { %1105 = vmatprep.subr.bf16.mxu0 %v1828_v10  ;;  %1117 = vmatprep.subr.bf16.mxu1 %v1828_v10 }
  0x2f   :  { %1107 = vmatpush3.bf16.msra.mxu0 %v1106_v62 }
  0x30   :  { %1108 = vmatprep.subr.bf16.mxu0 %v1828_v10 }
  0x31   :  { %94 = vadd.xlane.f32.xlu0 %v93_v15  ;;  %v136_v15 = vld [vmem:[%s1821_s2 + $0x10] sm:$0xff] }
  0x33   :  { %73 = vadd.xlane.f32.xlu1 %v72_v16  ;;  %v137_v16 = vld [vmem:[%s1821_s2 + $0x18] sm:$0xff] }
  0x35   :  { %97 = vadd.xlane.f32.xlu0 %v96_v21  ;;  %v352_v21 = vsel %vm254_vm0, %v1233_v5, 0.0 }
  0x37   :  { %76 = vadd.xlane.f32.xlu1 %v75_v22  ;;  %v1109_v22 = vpack.c.bf16 %v137_v16, %v136_v15 }
  0x39   :  { %100 = vadd.xlane.f32.xlu0 %v99_v27  ;;  %1110 = vmatpush3.bf16.msra.mxu0 %v1109_v22  ;;  %v138_v27 = vld [vmem:[%s1821_s2 + $0x20] sm:$0xff]  ;;  %v343_v22 = vsel %vm254_vm0, %v1240_v6, 0.0 }
  0x3a   :  { %1111 = vmatprep.subr.bf16.mxu0 %v1828_v10 }
  0x3b   :  { %79 = vadd.xlane.f32.xlu1 %v78_v28  ;;  %v139_v28 = vld [vmem:[%s1821_s2 + $0x28] sm:$0xff] }
  0x3d   :  { %103 = vadd.xlane.f32.xlu0 %v102_v33  ;;  %v1112_v33 = vpack.c.bf16 %v139_v28, %v138_v27  ;;  %v355_v28 = vsel %vm254_vm0, %v1245_v7, 0.0 }
  0x3f   :  { %82 = vadd.xlane.f32.xlu1 %v81_v34  ;;  %1113 = vmatpush3.bf16.msra.mxu0 %v1112_v33  ;;  %v140_v34 = vld [vmem:[%s1821_s2 + $0x30] sm:$0xff]  ;;  %v1008_v33 = vld [vmem:[%s1822_s3 + $0x20] sm:$0xff] }
  0x40   :  { %1114 = vmatprep.subr.bf16.mxu0 %v1828_v10 }
  0x41   :  { %106 = vadd.xlane.f32.xlu0 %v105_v39  ;;  %v141_v39 = vld [vmem:[%s1821_s2 + $0x38] sm:$0xff] }
  0x43   :  { %85 = vadd.xlane.f32.xlu1 %v84_v40  ;;  %v1115_v40 = vpack.c.bf16 %v141_v39, %v140_v34  ;;  %v1009_v34 = vld [vmem:[%s1822_s3 + $0x28] sm:$0xff] }
  0x44   :  { %v1118_v39 = vpack.c.bf16 %v1009_v34, %v1008_v33 }
  0x45   :  { %109 = vadd.xlane.f32.xlu0 %v108_v45  ;;  %v1830_v45 = vmov 0.0   ;;  %1116 = vmatpush3.bf16.msra.mxu0 %v1115_v40  ;;  %v1010_v40 = vld [vmem:[%s1822_s3 + $0x30] sm:$0xff] }
  0x46   :  { %1061 = vmatprep.mubr.msk.f32.mxu0 %vm1154_vm1, %v1830_v45  ;;  %1072 = vmatprep.mubr.msk.f32.mxu1 %vm1154_vm1, %v1830_v45 }
  0x47   :  { %88 = vadd.xlane.f32.xlu1 %v87_v46  ;;  %1123 = vmatprep.subr.bf16.mxu0 %v1828_v10 }
  0x48   :  { %1119 = vmatpush3.bf16.msra.mxu1 %v1118_v39 }
  0x49   :  { %112 = vadd.xlane.f32.xlu0 %v111_v51  ;;  %1120 = vmatprep.subr.bf16.mxu1 %v1828_v10 }
  0x4b   :  { %91 = vadd.xlane.f32.xlu1 %v90_v52 }
  0x4d   :  { %115 = vadd.xlane.f32.xlu0 %v114_v55 }
  0x4f   :  { %335 = vadd.xlane.f32.xlu1 %v334_v56 }
  0x51   :  { %338 = vadd.xlane.f32.xlu0 %v337_v57 }
  0x53   :  { %347 = vadd.xlane.f32.xlu1 %v346_v58 }
  0x55   :  { %350 = vadd.xlane.f32.xlu0 %v349_v61 }
  0x57   :  { %341 = vadd.xlane.f32.xlu1 %v340_v63 }
  0x59   :  { %353 = vadd.xlane.f32.xlu0 %v352_v21 }
  0x74   :  { %v380_v46 = vpop.permute.xlu0 %379 }
  0x75   :  { %v388_v51 = vpop.permute.xlu1 %387  ;;  %v403_v52 = vsel %vm254_vm0, %v380_v46, 0.0  ;;  %v1011_v46 = vld [vmem:[%s1822_s3 + $0x38] sm:$0xff] }
  0x76   :  { %404 = vadd.xlane.f32.xlu1 %v403_v52  ;;  %v415_v55 = vsel %vm254_vm0, %v388_v51, 0.0  ;;  %v1121_v51 = vpack.c.bf16 %v1011_v46, %v1010_v40  ;;  %v158_v52 = vlaneseq }
  0x78   :  { %v382_v56 = vpop.permute.xlu0 %381  ;;  %1122 = vmatpush3.bf16.msra.mxu1 %v1121_v51 }
  0x79   :  { %v390_v57 = vpop.permute.xlu1 %389  ;;  %v406_v58 = vsel %vm254_vm0, %v382_v56, 0.0  ;;  %1129 = vmatprep.subr.bf16.mxu1 %v1828_v10  ;;  %v1513_v56 = vand.u32 127, %v158_v52 }
  0x7a   :  { %416 = vadd.xlane.f32.xlu1 %v415_v55  ;;  %407 = vadd.xlane.f32.xlu0 %v406_v58  ;;  %v418_v59 = vsel %vm254_vm0, %v390_v57, 0.0  ;;  %v1515_v58 = vshrl.u32 %v158_v52, 7 }
  0x7b   :  { %v178_v33 = vadd.s32 4294967272, %v1513_v56  ;;  %vm941_vm11 = vcmp.ge.s32.totalorder %v1513_v56, 64 }
  0x7c   :  { %v384_v60 = vpop.permute.xlu0 %383 }
  0x7d   :  { %v392_v61 = vpop.permute.xlu1 %391  ;;  %v409_v62 = vsel %vm254_vm0, %v384_v60, 0.0 }
  0x7e   :  { %410 = vadd.xlane.f32.xlu1 %v409_v62  ;;  %419 = vadd.xlane.f32.xlu0 %v418_v59  ;;  %v421_v63 = vsel %vm254_vm0, %v392_v61, 0.0  ;;  %v164_v59 = vadd.s32 4294967288, %v1513_v56  ;;  %v171_v62 = vadd.s32 4294967280, %v1513_v56 }
  0x80   :  { %v386_v15 = vpop.permute.xlu0 %385  ;;  %v1528_v34 = vsub.s32 %v171_v62, %v1515_v58 }
  0x81   :  { %v394_v16 = vpop.permute.xlu1 %393  ;;  %v412_v21 = vsel %vm254_vm0, %v386_v15, 0.0 }
  0x82   :  { %413 = vadd.xlane.f32.xlu1 %v412_v21  ;;  %422 = vadd.xlane.f32.xlu0 %v421_v63  ;;  %v424_v27 = vsel %vm254_vm0, %v394_v16, 0.0  ;;  %v1521_v63 = vsub.s32 %v1513_v56, %v1515_v58  ;;  %v1524_v16 = vsub.s32 %v164_v59, %v1515_v58  ;;  %v185_v59 = vadd.s32 4294967264, %v1513_v56 }
  0x86   :  { %344 = vadd.xlane.f32.xlu1 %v343_v22  ;;  %425 = vadd.xlane.f32.xlu0 %v424_v27 }
  0x8a   :  { %356 = vadd.xlane.f32.xlu0 %v355_v28 }
  0xba   :  { %v71_v55 = vpop.xlane.xlu0 %70 }
  0xbb   :  { %v118_v15 = vmul.f32 0.00390625, %v71_v55 }
  0xbd   :  { %v163_v46 = vrot.slane %v118_v15, %v1521_v63 }
  0xbe   :  { %v95_v57 = vpop.xlane.xlu0 %94 }
  0xbf   :  { %v126_v27 = vmul.f32 0.00390625, %v95_v57 }
  0xc0   :  { %v74_v60 = vpop.xlane.xlu1 %73 }
  0xc1   :  { %v119_v21 = vmul.f32 0.00390625, %v74_v60  ;;  %v216_v60 = vrot.slane %v126_v27, %v1521_v63  ;;  %v188_v27 = vsub.s32 %v185_v59, %v1515_v58 }
  0xc2   :  { %v98_v61 = vpop.xlane.xlu0 %97 }
  0xc3   :  { %v127_v28 = vmul.f32 0.00390625, %v98_v61  ;;  %v168_v51 = vrot.slane %v119_v21, %v1524_v16  ;;  %v1536_v61 = vsub.s32 %v178_v33, %v1515_v58 }
  0xc4   :  { %v77_v22 = vpop.xlane.xlu1 %76 }
  0xc5   :  { %v120_v39 = vmul.f32 0.00390625, %v77_v22  ;;  %v220_v57 = vrot.slane %v127_v28, %v1524_v16  ;;  %v170_v15 = vsel %vm169_vm2, %v168_v51, %v163_v46  ;;  %v199_v46 = vadd.s32 4294967248, %v1513_v56 }
  0xc6   :  { %v101_v40 = vpop.xlane.xlu0 %100 }
  0xc7   :  { %v128_v55 = vmul.f32 0.00390625, %v101_v40  ;;  %v175_v22 = vrot.slane %v120_v39, %v1528_v34  ;;  %v192_v40 = vadd.s32 4294967256, %v1513_v56  ;;  %v221_v28 = vsel %vm169_vm2, %v220_v57, %v216_v60 }
  0xc8   :  { %v80_v52 = vpop.xlane.xlu1 %79 }
  0xc9   :  { %v121_v62 = vmul.f32 0.00390625, %v80_v52  ;;  %v225_v54 = vrot.slane %v128_v55, %v1528_v34  ;;  %v177_v52 = vsel %vm176_vm3, %v175_v22, %v170_v15  ;;  %v195_v42 = vsub.s32 %v192_v40, %v1515_v58 }
  0xca   :  { %v104_v10 = vpop.xlane.xlu0 %103  ;;  %v202_v22 = vsub.s32 %v199_v46, %v1515_v58  ;;  %v206_v15 = vadd.s32 4294967240, %v1513_v56 }
  0xcb   :  { %v129_v21 = vmul.f32 0.00390625, %v104_v10  ;;  %v182_v33 = vrot.slane %v121_v62, %v1536_v61  ;;  %v226_v55 = vsel %vm176_vm3, %v225_v54, %v221_v28 }
  0xcc   :  { %v83_v45 = vpop.xlane.xlu1 %82 }
  0xcd   :  { %v122_v53 = vmul.f32 0.00390625, %v83_v45  ;;  %v230_v10 = vrot.slane %v129_v21, %v1536_v61  ;;  %v184_v60 = vsel %vm183_vm4, %v182_v33, %v177_v52  ;;  %v209_v33 = vsub.s32 %v206_v15, %v1515_v58  ;;  %v370_v15 = vld [vmem:[%s1822_s3 + $0x18] sm:$0xff] }
  0xce   :  { %v107_v39 = vpop.xlane.xlu0 %106 }
  0xcf   :  { %v130_v51 = vmul.f32 0.00390625, %v107_v39  ;;  %v189_v59 = vrot.slane %v122_v53, %v188_v27  ;;  %v231_v30 = vsel %vm183_vm4, %v230_v10, %v226_v55 }
  0xd0   :  { %v86_v41 = vpop.xlane.xlu1 %85 }
  0xd1   :  { %v123_v45 = vmul.f32 0.00390625, %v86_v41  ;;  %v235_v57 = vrot.slane %v130_v51, %v188_v27  ;;  %v191_v40 = vsel %vm190_vm5, %v189_v59, %v184_v60 }
  0xd2   :  { %v110_v62 = vpop.xlane.xlu0 %109 }
  0xd3   :  { %v196_v21 = vrot.slane %v123_v45, %v195_v42  ;;  %v131_v39 = vmul.f32 0.00390625, %v110_v62  ;;  %v236_v53 = vsel %vm190_vm5, %v235_v57, %v231_v30  ;;  %v368_v30 = vld [vmem:[%s1822_s3 + $0x8] sm:$0xff] }
  0xd4   :  { %v89_v29 = vpop.xlane.xlu1 %88 }
  0xd5   :  { %v124_v48 = vmul.f32 0.00390625, %v89_v29  ;;  %v240_v54 = vrot.slane %v131_v39, %v195_v42  ;;  %v198_v27 = vsel %vm197_vm6, %v196_v21, %v191_v40  ;;  %v367_v29 = vld [vmem:[%s1822_s3] sm:$0xff] }
  0xd6   :  { %v113_v28 = vpop.xlane.xlu0 %112  ;;  %v1124_v57 = vpack.c.bf16 %v368_v30, %v367_v29 }
  0xd7   :  { %v203_v41 = vrot.slane %v124_v48, %v202_v22  ;;  %v132_v52 = vmul.f32 0.00390625, %v113_v28  ;;  %v241_v47 = vsel %vm197_vm6, %v240_v54, %v236_v53 }
  0xd8   :  { %v92_v46 = vpop.xlane.xlu1 %91 }
  0xd9   :  { %v125_v51 = vmul.f32 0.00390625, %v92_v46  ;;  %v245_v18 = vrot.slane %v132_v52, %v202_v22  ;;  %v205_v10 = vsel %vm204_vm7, %v203_v41, %v198_v27  ;;  %v369_v22 = vld [vmem:[%s1822_s3 + $0x10] sm:$0xff] }
  0xda   :  { %v116_v45 = vpop.xlane.xlu0 %115  ;;  %v1127_v39 = vpack.c.bf16 %v370_v15, %v369_v22 }
  0xdb   :  { %v210_v55 = vrot.slane %v125_v51, %v209_v33  ;;  %v133_v59 = vmul.f32 0.00390625, %v116_v45  ;;  %v246_v42 = vsel %vm204_vm7, %v245_v18, %v241_v47  ;;  %v1856_v18 = vmov 0.0  }
  0xdc   :  { %v1857_v47 = vmov 0.0|0.0   ;;  %v336_v40 = vpop.xlane.xlu1 %335 }
  0xdd   :  { %v250_v48 = vrot.slane %v133_v59, %v209_v33  ;;  %v212_v60 = vsel %vm211_vm8, %v210_v55, %v205_v10  ;;  %v359_v55 = vmul.f32 0.015625, %v336_v40 }
  0xde   :  { %v339_v54 = vpop.xlane.xlu0 %338 }
  0xdf   :  { %v251_v62 = vsel %vm211_vm8, %v250_v48, %v246_v42  ;;  %v360_v59 = vmul.f32 0.015625, %v339_v54 }
  0xe0   :  { %v253_v21 = vsel %vm252_vm9, %v251_v62, %v212_v60  ;;  %v348_v53 = vpop.xlane.xlu1 %347 }
  0xe1   :  { %1062 = vmatmul.mubr.msk.f32.vlgmr.msra.gmra.mrb[0].mxu0 %vm254_vm0, %v253_v21  ;;  %v363_v45 = vmul.f32 0.015625, %v348_v53  ;;  %v575_v36 = vrot.slane %v360_v59, %v1524_v16 }
  0xe2   :  { %1125 = vmatpush3.bf16.msra.mxu0 %v1124_v57  ;;  %1083 = vmatprep.mubr.msk.f32.mxu0 %vm1154_vm1, %v1856_v18  ;;  %v351_v41 = vpop.xlane.xlu0 %350 }
  0xe3   :  { %1126 = vmatprep.subr.bf16.mxu0 %v1857_v47  ;;  %v364_v29 = vmul.f32 0.015625, %v351_v41  ;;  %v590_v17 = vrot.slane %v363_v45, %v1521_v63 }
  0xe4   :  { %v342_v28 = vpop.xlane.xlu1 %341 }
  0xe5   :  { %v361_v35 = vmul.f32 0.015625, %v342_v28  ;;  %v594_v40 = vrot.slane %v364_v29, %v1524_v16 }
  0xe6   :  { %1128 = vmatpush3.bf16.msra.mxu0 %v1127_v39  ;;  %v354_v33 = vpop.xlane.xlu0 %353  ;;  %v571_v39 = vrot.slane %v359_v55, %v1521_v63 }
  0xe7   :  { %v365_v41 = vmul.f32 0.015625, %v354_v33 }
  0xe8   :  { %v576_v29 = vsel %vm169_vm2, %v575_v36, %v571_v39 }
 0x103   :  { %v405_v27 = vpop.xlane.xlu1 %404 }
 0x104   :  { %v427_v48 = vmul.f32 0.015625, %v405_v27 }
 0x106   :  { %v451_v27 = vrot.slane %v427_v48, %v1521_v63  ;;  %v595_v48 = vsel %vm169_vm2, %v594_v40, %v590_v17 }
 0x107   :  { %v417_v52 = vpop.xlane.xlu1 %416  ;;  %v408_v46 = vpop.xlane.xlu0 %407 }
 0x108   :  { %v428_v30 = vmul.f32 0.015625, %v408_v46  ;;  %v431_v22 = vmul.f32 0.015625, %v417_v52 }
 0x10a   :  { %v455_v54 = vrot.slane %v428_v30, %v1524_v16  ;;  %v470_v55 = vrot.slane %v431_v22, %v1521_v63 }
 0x10b   :  { %v411_v51 = vpop.xlane.xlu1 %410  ;;  %v420_v10 = vpop.xlane.xlu0 %419 }
 0x10c   :  { %v432_v42 = vmul.f32 0.015625, %v420_v10  ;;  %v429_v60 = vmul.f32 0.015625, %v411_v51  ;;  %v456_v33 = vsel %vm169_vm2, %v455_v54, %v451_v27 }
 0x10e   :  { %v474_v53 = vrot.slane %v432_v42, %v1524_v16  ;;  %v460_v52 = vrot.slane %v429_v60, %v1528_v34  ;;  %v580_v16 = vrot.slane %v361_v35, %v1528_v34  ;;  %v599_v60 = vrot.slane %v365_v41, %v1528_v34  ;;  %v682_v41 = vld [vmem:[%s1823_s5 + $0x8] sm:$0xff] }
 0x10f   :  { %v414_v57 = vpop.xlane.xlu1 %413  ;;  %v423_v62 = vpop.xlane.xlu0 %422 }
 0x110   :  { %v430_v15 = vmul.f32 0.015625, %v414_v57  ;;  %v433_v21 = vmul.f32 0.015625, %v423_v62  ;;  %v475_v30 = vsel %vm169_vm2, %v474_v53, %v470_v55  ;;  %v461_v63 = vsel %vm176_vm3, %v460_v52, %v456_v33  ;;  %v684_v52 = vld [vmem:[%s1823_s5 + $0x18] sm:$0xff]  ;;  %v1007_v33 = vld [vmem:[%s1824_s4] ss:$0 sm:$0xff] }
 0x111   :  { %v581_v17 = vsel %vm176_vm3, %v580_v16, %v576_v29 }
 0x112   :  { %v479_v46 = vrot.slane %v433_v21, %v1528_v34  ;;  %v465_v45 = vrot.slane %v430_v15, %v1536_v61  ;;  %v600_v34 = vsel %vm176_vm3, %v599_v60, %v595_v48 }
 0x113   :  { %v345_v51 = vpop.xlane.xlu1 %344  ;;  %v426_v10 = vpop.xlane.xlu0 %425 }
 0x114   :  { %v362_v28 = vmul.f32 0.015625, %v345_v51  ;;  %v434_v59 = vmul.f32 0.015625, %v426_v10  ;;  %v480_v57 = vsel %vm176_vm3, %v479_v46, %v475_v30  ;;  %v466_v35 = vsel %vm183_vm4, %v465_v45, %v461_v63  ;;  %v685_v51 = vld [vmem:[%s1823_s5 + $0x20] sm:$0xff]  ;;  %v686_v10 = vld [vmem:[%s1823_s5 + $0x28] sm:$0xff]  ;;  %v687_v45 = vld [vmem:[%s1823_s5 + $0x30] sm:$0xff] }
 0x115   :  { %v1136_v55 = vpack.c.bf16 %v686_v10, %v685_v51 }
 0x116   :  { %v484_v42 = vrot.slane %v434_v59, %v1536_v61  ;;  %v585_v36 = vrot.slane %v362_v28, %v1536_v61  ;;  %v688_v28 = vld [vmem:[%s1823_s5 + $0x38] sm:$0xff] }
 0x117   :  { %v357_v62 = vpop.xlane.xlu0 %356  ;;  %v1139_v59 = vpack.c.bf16 %v688_v28, %v687_v45 }
 0x118   :  { %v366_v22 = vmul.f32 0.015625, %v357_v62  ;;  %v485_v15 = vsel %vm183_vm4, %v484_v42, %v480_v57  ;;  %v586_v40 = vsel %vm183_vm4, %v585_v36, %v581_v17  ;;  %v1014_v36 = vld [vmem:[%s1825_s6] ss:$0 sm:$0xff] }
 0x119   :  { %v486_v21 = vsel %vm252_vm9, %v485_v15, %v466_v35 }
 0x11a   :  { %v604_v39 = vrot.slane %v366_v22, %v1536_v61  ;;  %1073 = vmatmul.mubr.msk.f32.vlgmr.msra.gmra.mrb[0].mxu1 %vm487_vm10, %v486_v21  ;;  %v681_v61 = vld [vmem:[%s1823_s5] sm:$0xff] }
 0x11b   :  { %1102 = vmatprep.mubr.msk.f32.mxu1 %vm1154_vm1, %v1856_v18  ;;  %v683_v18 = vld [vmem:[%s1823_s5 + $0x10] sm:$0xff]  ;;  %v1130_v27 = vpack.c.bf16 %v682_v41, %v681_v61 }
 0x11c   :  { %v605_v54 = vsel %vm183_vm4, %v604_v39, %v600_v34  ;;  %v1133_v46 = vpack.c.bf16 %v684_v52, %v683_v18  ;;  %v777_v34 = vsub.s32 0, %v1515_v58 }
 0x11d   :  { %v606_v53 = vsel %vm252_vm9, %v605_v54, %v586_v40  ;;  %1131 = vmatpush3.bf16.msra.mxu1 %v1130_v27 }
 0x11e   :  { %1084 = vmatmul.mubr.msk.f32.vlgmr.msra.gmra.mrb[2].mxu0 %vm487_vm10, %v606_v53  ;;  %1132 = vmatprep.subr.bf16.mxu1 %v1857_v47  ;;  %v812_v53 = vsub.s32 1, %v1515_v58 }
 0x121   :  { %1134 = vmatpush3.bf16.msra.mxu1 %v1133_v46 }
 0x122   :  { %1135 = vmatprep.subr.bf16.mxu1 %v1857_v47 }
 0x125   :  { %1137 = vmatpush3.bf16.msra.mxu1 %v1136_v55 }
 0x126   :  { %1138 = vmatprep.subr.bf16.mxu1 %v1857_v47 }
 0x129   :  { %1140 = vmatpush3.bf16.msra.mxu1 %v1139_v59 }
 0x1b4   :  { %v323_v29 = vpop.f32.mrb[0].mxu0 }
 0x1b5   :  { %v1063_v16 = vpop.f32.mrb[1].mxu0  ;;  %v333_v30 = vadd.f32 %v1007_v33, %v323_v29 }
 0x1ed   :  { %v556_v42 = vpop.f32.mrb[0].mxu1 }
 0x1ee   :  { %v1142_v48 = vadd.f32 %v556_v42, %v333_v30  ;;  %v1074_v47 = vpop.f32.mrb[1].mxu1 }
 0x1f1   :  { %v675_v60 = vpop.f32.mrb[2].mxu0 }
 0x1f2   :  { %v1143_v63 = vadd.f32 %v1142_v48, %v675_v60  ;;  %v1085_v57 = vpop.f32.mrb[3].mxu0 }
 0x1f4   :  { %v680_v62 = vmax.f32 %v1143_v63, 0.0 }
 0x1f6   :  { %1103 = vmatmul.mubr.msk.f32.vlgmr.msra.gmra.mrb[2].mxu1 %vm254_vm0, %v680_v62 }
 0x2c9   :  { %v765_v22 = vpop.f32.mrb[2].mxu1 }
 0x2ca   :  { %v766_v35 = vadd.f32 %v1014_v36, %v765_v22  ;;  %v1104_v15 = vpop.f32.mrb[3].mxu1 }
 0x2cc   :  { %v1016_v21 = vmul.f32 -1.442695, %v766_v35 }
 0x2ce   :  { %1148 = vpow2.f32 %v1016_v21 }
 0x2d8   :  { %v1149_v39 = vpop.eup %1148 }
 0x2d9   :  { %v772_v17 = vadd.f32 1.0, %v1149_v39 }
 0x2db   :  { %1150 = vrcp.f32 %v772_v17 }
 0x2e5   :  { %v1151_v40 = vpop.eup %1150 }
 0x2e6   :  { %v778_v54 = vrot.slane %v1151_v40, %v777_v34  ;;  %v813_v61 = vrot.slane %v1151_v40, %v812_v53 }
 0x2e8   :  { %784 = vbcast.lane.b32.xlu0 %v778_v54, 264  ;;  %780 = vbcast.lane.b32.xlu1 %v778_v54, 256 }
 0x2ec   :  { %796 = vbcast.lane.b32.xlu0 %v778_v54, 288  ;;  %788 = vbcast.lane.b32.xlu1 %v778_v54, 272 }
 0x2f0   :  { %911 = vbcast.lane.b32.xlu0 %v778_v54, 320  ;;  %792 = vbcast.lane.b32.xlu1 %v778_v54, 280 }
 0x2f4   :  { %919 = vbcast.lane.b32.xlu0 %v778_v54, 336  ;;  %800 = vbcast.lane.b32.xlu1 %v778_v54, 296 }
 0x2f8   :  { %927 = vbcast.lane.b32.xlu0 %v813_v61, 320  ;;  %915 = vbcast.lane.b32.xlu1 %v778_v54, 328 }
 0x2fc   :  { %935 = vbcast.lane.b32.xlu0 %v813_v61, 336  ;;  %923 = vbcast.lane.b32.xlu1 %v778_v54, 344 }
 0x300   :  { %944 = vbcast.lane.b32.xlu0 %v778_v54, 352  ;;  %931 = vbcast.lane.b32.xlu1 %v813_v61, 328 }
 0x304   :  { %952 = vbcast.lane.b32.xlu0 %v778_v54, 368  ;;  %939 = vbcast.lane.b32.xlu1 %v813_v61, 344 }
 0x308   :  { %960 = vbcast.lane.b32.xlu0 %v813_v61, 352  ;;  %948 = vbcast.lane.b32.xlu1 %v778_v54, 360 }
 0x30c   :  { %968 = vbcast.lane.b32.xlu0 %v813_v61, 368  ;;  %956 = vbcast.lane.b32.xlu1 %v778_v54, 376 }
 0x310   :  { %804 = vbcast.lane.b32.xlu0 %v778_v54, 304  ;;  %964 = vbcast.lane.b32.xlu1 %v813_v61, 360 }
 0x314   :  { %815 = vbcast.lane.b32.xlu0 %v813_v61, 256  ;;  %972 = vbcast.lane.b32.xlu1 %v813_v61, 376 }
 0x318   :  { %823 = vbcast.lane.b32.xlu0 %v813_v61, 272  ;;  %808 = vbcast.lane.b32.xlu1 %v778_v54, 312 }
 0x31c   :  { %831 = vbcast.lane.b32.xlu0 %v813_v61, 288  ;;  %819 = vbcast.lane.b32.xlu1 %v813_v61, 264 }
 0x320   :  { %839 = vbcast.lane.b32.xlu0 %v813_v61, 304  ;;  %827 = vbcast.lane.b32.xlu1 %v813_v61, 280 }
 0x324   :  { %835 = vbcast.lane.b32.xlu1 %v813_v61, 296 }
 0x328   :  { %843 = vbcast.lane.b32.xlu1 %v813_v61, 312 }
 0x35a   :  { %v785_v58 = vpop.permute.xlu0 %784  ;;  %v781_v41 = vpop.permute.xlu1 %780 }
 0x35b   :  { %v847_v18 = vmul.f32 %v785_v58, %v1274_v13  ;;  %v848_v27 = vmul.f32 %v785_v58, %v1279_v14  ;;  %v845_v52 = vmul.f32 %v781_v41, %v1252_v8  ;;  %v846_v46 = vmul.f32 %v781_v41, %v1257_v9 }
 0x35d   :  { %879 = vst [vmem:[%s1826_s7 + $0x10] sm:$0xff] %v847_v18  ;;  %880 = vst [vmem:[%s1826_s7 + $0x18] sm:$0xff] %v848_v27  ;;  %v1859_v18 = vld [vmem:[#allocation7_spill] sm:$0xff] }
 0x35e   :  { %877 = vst [vmem:[%s1826_s7] sm:$0xff] %v845_v52  ;;  %878 = vst [vmem:[%s1826_s7 + $0x8] sm:$0xff] %v846_v46  ;;  %v797_v13 = vpop.permute.xlu0 %796  ;;  %v789_v8 = vpop.permute.xlu1 %788  ;;  %v1860_v52 = vld [vmem:[#allocation2_spill] sm:$0xff] }
 0x35f   :  { %v853_v9 = vmul.f32 %v797_v13, %v1346_v31  ;;  %v854_v14 = vmul.f32 %v797_v13, %v1351_v32  ;;  %v849_v51 = vmul.f32 %v789_v8, %v1298_v19  ;;  %v850_v10 = vmul.f32 %v789_v8, %v1303_v20  ;;  %v1861_v13 = vld [vmem:[#allocation3_spill] sm:$0xff] }
 0x361   :  { %885 = vst [vmem:[%s1826_s7 + $0x40] sm:$0xff] %v853_v9  ;;  %886 = vst [vmem:[%s1826_s7 + $0x48] sm:$0xff] %v854_v14 }
 0x362   :  { %881 = vst [vmem:[%s1826_s7 + $0x20] sm:$0xff] %v849_v51  ;;  %882 = vst [vmem:[%s1826_s7 + $0x28] sm:$0xff] %v850_v10  ;;  %v912_v31 = vpop.permute.xlu0 %911  ;;  %v793_v19 = vpop.permute.xlu1 %792  ;;  %v1862_v51 = vld [vmem:[#allocation10_spill] sm:$0xff] }
 0x363   :  { %v851_v20 = vmul.f32 %v793_v19, %v1322_v25  ;;  %v852_v32 = vmul.f32 %v793_v19, %v1327_v26 }
 0x365   :  { %883 = vst [vmem:[%s1826_s7 + $0x30] sm:$0xff] %v851_v20  ;;  %884 = vst [vmem:[%s1826_s7 + $0x38] sm:$0xff] %v852_v32  ;;  %v1864_v20 = vld [vmem:[#allocation4_spill] sm:$0xff] }
 0x366   :  { %v920_v55 = vpop.permute.xlu0 %919  ;;  %v801_v45 = vpop.permute.xlu1 %800 }
 0x367   :  { %v855_v28 = vmul.f32 %v801_v45, %v1370_v37  ;;  %v856_v59 = vmul.f32 %v801_v45, %v1375_v38 }
 0x369   :  { %887 = vst [vmem:[%s1826_s7 + $0x50] sm:$0xff] %v855_v28  ;;  %888 = vst [vmem:[%s1826_s7 + $0x58] sm:$0xff] %v856_v59  ;;  %v1866_v59 = vld [vmem:[#allocation8_spill] sm:$0xff] }
 0x36a   :  { %v928_v25 = vpop.permute.xlu0 %927  ;;  %v916_v26 = vpop.permute.xlu1 %915 }
 0x36e   :  { %v936_v29 = vpop.permute.xlu0 %935  ;;  %v924_v16 = vpop.permute.xlu1 %923 }
 0x372   :  { %v945_v33 = vpop.permute.xlu0 %944  ;;  %v932_v30 = vpop.permute.xlu1 %931 }
 0x373   :  { %v974_v37 = vsel %vm941_vm11, %v945_v33, %v912_v31  ;;  %v1863_v31 = vld [vmem:[#allocation11_spill] sm:$0xff]  ;;  %v1868_v33 = vld [vmem:[#allocation12_spill] sm:$0xff] }
 0x374   :  { %v982_v38 = vmul.f32 %v974_v37, %v1204_v0  ;;  %v1869_v37 = vld [vmem:[#allocation13_spill] sm:$0xff] }
 0x376   :  { %990 = vst [vmem:[%s1827_s8] sm:$0xff] %v982_v38  ;;  %v953_v42 = vpop.permute.xlu0 %952  ;;  %v940_v48 = vpop.permute.xlu1 %939 }
 0x377   :  { %v976_v47 = vsel %vm941_vm11, %v953_v42, %v920_v55  ;;  %v1865_v55 = vld [vmem:[#allocation5_spill] sm:$0xff] }
 0x378   :  { %v984_v60 = vmul.f32 %v976_v47, %v1228_v4 }
 0x37a   :  { %992 = vst [vmem:[%s1827_s8 + $0x10] sm:$0xff] %v984_v60  ;;  %v961_v63 = vpop.permute.xlu0 %960  ;;  %v949_v57 = vpop.permute.xlu1 %948 }
 0x37b   :  { %v978_v0 = vsel %vm941_vm11, %v961_v63, %v928_v25  ;;  %v975_v62 = vsel %vm941_vm11, %v949_v57, %v916_v26  ;;  %v1867_v26 = vld [vmem:[#allocation9_spill] sm:$0xff] }
 0x37c   :  { %v986_v36 = vmul.f32 %v978_v0, %v1209_v1  ;;  %v983_v22 = vmul.f32 %v975_v62, %v1216_v2 }
 0x37e   :  { %994 = vst [vmem:[%s1827_s8 + $0x20] sm:$0xff] %v986_v36  ;;  %991 = vst [vmem:[%s1827_s8 + $0x8] sm:$0xff] %v983_v22  ;;  %v969_v4 = vpop.permute.xlu0 %968  ;;  %v957_v35 = vpop.permute.xlu1 %956 }
 0x37f   :  { %v980_v15 = vsel %vm941_vm11, %v969_v4, %v936_v29  ;;  %v977_v21 = vsel %vm941_vm11, %v957_v35, %v924_v16 }
 0x380   :  { %v988_v1 = vmul.f32 %v980_v15, %v1233_v5  ;;  %v985_v2 = vmul.f32 %v977_v21, %v1240_v6 }
 0x382   :  { %996 = vst [vmem:[%s1827_s8 + $0x30] sm:$0xff] %v988_v1  ;;  %993 = vst [vmem:[%s1827_s8 + $0x18] sm:$0xff] %v985_v2  ;;  %v805_v39 = vpop.permute.xlu0 %804  ;;  %v965_v17 = vpop.permute.xlu1 %964 }
 0x383   :  { %v857_v34 = vmul.f32 %v805_v39, %v1394_v43  ;;  %v858_v40 = vmul.f32 %v805_v39, %v1399_v44  ;;  %v979_v54 = vsel %vm941_vm11, %v965_v17, %v932_v30 }
 0x384   :  { %v987_v5 = vmul.f32 %v979_v54, %v1221_v3 }
 0x385   :  { %889 = vst [vmem:[%s1826_s7 + $0x60] sm:$0xff] %v857_v34  ;;  %890 = vst [vmem:[%s1826_s7 + $0x68] sm:$0xff] %v858_v40 }
 0x386   :  { %995 = vst [vmem:[%s1827_s8 + $0x28] sm:$0xff] %v987_v5  ;;  %v816_v6 = vpop.permute.xlu0 %815  ;;  %v973_v43 = vpop.permute.xlu1 %972 }
 0x387   :  { %v861_v44 = vmul.f32 %v816_v6, %v1264_v11  ;;  %v862_v53 = vmul.f32 %v816_v6, %v1269_v12  ;;  %v981_v3 = vsel %vm941_vm11, %v973_v43, %v940_v48 }
 0x388   :  { %v989_v61 = vmul.f32 %v981_v3, %v1245_v7 }
 0x389   :  { %893 = vst [vmem:[%s1826_s7 + $0x80] sm:$0xff] %v861_v44  ;;  %894 = vst [vmem:[%s1826_s7 + $0x88] sm:$0xff] %v862_v53 }
 0x38a   :  { %997 = vst [vmem:[%s1827_s8 + $0x38] sm:$0xff] %v989_v61  ;;  %v824_v11 = vpop.permute.xlu0 %823  ;;  %v809_v58 = vpop.permute.xlu1 %808 }
 0x38b   :  { %v865_v12 = vmul.f32 %v824_v11, %v1312_v23  ;;  %v866_v56 = vmul.f32 %v824_v11, %v1317_v24  ;;  %v859_v7 = vmul.f32 %v809_v58, %v1418_v49  ;;  %v860_v41 = vmul.f32 %v809_v58, %v1423_v50  ;;  %v1858_v49 = vld [vmem:[#allocation6_spill] sm:$0xff] }
 0x38d   :  { %897 = vst [vmem:[%s1826_s7 + $0xa0] sm:$0xff] %v865_v12  ;;  %898 = vst [vmem:[%s1826_s7 + $0xa8] sm:$0xff] %v866_v56 }
 0x38e   :  { %891 = vst [vmem:[%s1826_s7 + $0x70] sm:$0xff] %v859_v7  ;;  %892 = vst [vmem:[%s1826_s7 + $0x78] sm:$0xff] %v860_v41  ;;  %v832_v23 = vpop.permute.xlu0 %831  ;;  %v820_v24 = vpop.permute.xlu1 %819 }
 0x38f   :  { %v869_v50 = vmul.f32 %v832_v23, %v1858_v49  ;;  %v870_v27 = vmul.f32 %v832_v23, %v1859_v18  ;;  %v863_v46 = vmul.f32 %v820_v24, %v1860_v52  ;;  %v864_v8 = vmul.f32 %v820_v24, %v1861_v13 }
 0x391   :  { %901 = vst [vmem:[%s1826_s7 + $0xc0] sm:$0xff] %v869_v50  ;;  %902 = vst [vmem:[%s1826_s7 + $0xc8] sm:$0xff] %v870_v27 }
 0x392   :  { %895 = vst [vmem:[%s1826_s7 + $0x90] sm:$0xff] %v863_v46  ;;  %896 = vst [vmem:[%s1826_s7 + $0x98] sm:$0xff] %v864_v8  ;;  %v840_v9 = vpop.permute.xlu0 %839  ;;  %v828_v14 = vpop.permute.xlu1 %827 }
 0x393   :  { %v873_v10 = vmul.f32 %v840_v9, %v1862_v51  ;;  %v874_v19 = vmul.f32 %v840_v9, %v1863_v31  ;;  %v867_v32 = vmul.f32 %v828_v14, %v1864_v20  ;;  %v868_v45 = vmul.f32 %v828_v14, %v1865_v55 }
 0x395   :  { %905 = vst [vmem:[%s1826_s7 + $0xe0] sm:$0xff] %v873_v10  ;;  %906 = vst [vmem:[%s1826_s7 + $0xe8] sm:$0xff] %v874_v19 }
 0x396   :  { %899 = vst [vmem:[%s1826_s7 + $0xb0] sm:$0xff] %v867_v32  ;;  %900 = vst [vmem:[%s1826_s7 + $0xb8] sm:$0xff] %v868_v45  ;;  %v836_v28 = vpop.permute.xlu1 %835 }
 0x397   :  { %v871_v25 = vmul.f32 %v836_v28, %v1866_v59  ;;  %v872_v29 = vmul.f32 %v836_v28, %v1867_v26 }
 0x399   :  { %903 = vst [vmem:[%s1826_s7 + $0xd0] sm:$0xff] %v871_v25  ;;  %904 = vst [vmem:[%s1826_s7 + $0xd8] sm:$0xff] %v872_v29 }
 0x39a   :  { %v844_v16 = vpop.permute.xlu1 %843 }
 0x39b   :  { %v875_v30 = vmul.f32 %v844_v16, %v1868_v33  ;;  %v876_v38 = vmul.f32 %v844_v16, %v1869_v37 }
 0x39d   :  { %907 = vst [vmem:[%s1826_s7 + $0xf0] sm:$0xff] %v875_v30  ;;  %908 = vst [vmem:[%s1826_s7 + $0xf8] sm:$0xff] %v876_v38 }

</bundles_post_ra>
